<compile_context>
chip_gen: v6e
topology: v6e:2x2x1
jax: 0.10.0
libtpu: 0.0.40
codegen_flags: <defaults>
</compile_context>

<pallas_src>
import functools

import numpy as np
import jax
import jax.numpy as jnp
from jax.experimental import pallas as pl
from jax.experimental.pallas import tpu as pltpu

EPSILON = 1e-8  # shunt division-protection constant


def _round_up(x, m):
    return ((x + m - 1) // m) * m


def _vmem_limit_bytes():
    """Generation-aware VMEM request: ~75% of physical, capped at 100 MiB.

    v7x (64 MiB physical) -> 48 MiB; v5e/v6e (128 MiB physical) -> 96 MiB.
    """
    cap = 128 * 1024 * 1024
    try:
        cap = int(pltpu.get_tpu_info().vmem_capacity_bytes)
    except Exception:
        pass
    return int(min(cap * 3 // 4, 100 * 1024 * 1024))


# ----------------------------------------------------------------------------
# Kernel
# ----------------------------------------------------------------------------
def ei_shunt_kernel(x_ref, w_in_ref, w_zi_ref, ea_ref, g_ref, b_ref,
                    h_ref, stats_ref, acc_ref, *, ne):
    """One (batch tile, d tile) grid step.

    Grid = (batch tiles ["parallel"], d reduction tiles ["arbitrary", last]).
    acc_ref accumulates [ze | zi] = x @ [Wex^T | Wix^T] in f32 across d; the
    shunt epilogue (Wei contractions, divide, stats) runs on the last d step.
    """
    k = pl.program_id(1)
    tb = x_ref.shape[0]
    ne_p = h_ref.shape[-1]

    @pl.when(k == 0)
    def _init():
        acc_ref[...] = jnp.zeros_like(acc_ref)

    # MXU: fused excitatory/inhibitory drive for this d tile.
    acc_ref[...] += jnp.dot(x_ref[...], w_in_ref[...],
                            preferred_element_type=jnp.float32)

    @pl.when(k == pl.num_programs(1) - 1)
    def _epilogue():
        y = acc_ref[...]                       # (tb, ne_p + ni_p), f32
        ze = y[:, :ne_p]                       # (tb, ne_p)   lane-aligned split
        zi = y[:, ne_p:]                       # (tb, ni_p)

        # gamma-side scaling applied to zi in f32 (NOT baked into bf16 weights).
        zi_s = zi * ea_ref[...]                # (tb, ni_p)

        w_zi = w_zi_ref[...]                   # (ni_p, ne_p), f32 Wei^T
        corr = jnp.dot(zi, w_zi, preferred_element_type=jnp.float32)
        gamma = jnp.dot(zi_s, w_zi, preferred_element_type=jnp.float32) + EPSILON

        z_hat = ze - corr
        z = g_ref[...] * (z_hat / gamma) + b_ref[...]
        h_ref[...] = z.astype(h_ref.dtype)     # padded neuron cols have g=b=0 -> 0

        # Per-sample stats of z_hat over the *true* ne neurons (mask the padded
        # columns), unbiased std.  Stored lane-dense as a (2, tb) block.
        lane = jax.lax.broadcasted_iota(jnp.int32, z_hat.shape, 1)
        nmask = lane < ne
        zh = jnp.where(nmask, z_hat, 0.0)
        mu = jnp.sum(zh, axis=-1, keepdims=True) * (1.0 / ne)          # (tb, 1)
        dev = jnp.where(nmask, z_hat - mu, 0.0)
        var = jnp.sum(dev * dev, axis=-1, keepdims=True) * (1.0 / max(ne - 1, 1))
        std = jnp.sqrt(var)                                            # (tb, 1)

        lane128 = jax.lax.broadcasted_iota(jnp.int32, (tb, 128), 1)
        stats_cols = jnp.where(lane128 == 0, mu,
                               jnp.where(lane128 == 1, std, 0.0))      # (tb, 128)
        stats_ref[...] = stats_cols.T[:2, :].astype(stats_ref.dtype)   # (2, tb)


# ----------------------------------------------------------------------------
# Parameter preparation (hoist off the per-forward path)
# ----------------------------------------------------------------------------
def prepare_params(Wex, Wix, Wei, alpha, g, bias, *,
                   matmul_dtype=jnp.bfloat16, d_tile=None):
    """Precompute padded / transposed / fused weight operands.

    Call once per parameter update, not per forward: the transposes, concats and
    zero-padding here re-read/re-write the full weights in HBM.
    """
    ne, d = Wex.shape
    ni = Wix.shape[0]
    assert Wei.shape == (ne, ni)

    ne_p = _round_up(ne, 128)            # lane-dense h / aligned [ze|zi] split
    ni_p = _round_up(max(ni, 1), 8)      # sublane-aligned Wei^T

    mm_dtype = jnp.dtype(matmul_dtype if matmul_dtype is not None else Wex.dtype)

    # [Wex^T | Wix^T], zero-padded on the neuron / inhibitory axes.
    w_in = jnp.zeros((d, ne_p + ni_p), mm_dtype)
    w_in = w_in.at[:, :ne].set(Wex.T.astype(mm_dtype))
    w_in = w_in.at[:, ne_p:ne_p + ni].set(Wix.T.astype(mm_dtype))

    # Decide resident vs. d-streamed weights (v7x: only 64 MiB VMEM).
    vmem_limit = _vmem_limit_bytes()
    if d_tile is None:
        w_in_bytes = d * (ne_p + ni_p) * mm_dtype.itemsize
        d_tile = d if w_in_bytes <= (2 * vmem_limit) // 5 else 512
    d_p = _round_up(d, d_tile)
    if d_p != d:
        w_in = jnp.pad(w_in, ((0, d_p - d), (0, 0)))

    # Wei^T kept in f32 (tiny) so the correction / gamma contraction and the
    # exp(alpha) scaling of zi stay full precision even on the bf16 path.
    w_zi = jnp.zeros((ni_p, ne_p), jnp.float32).at[:ni, :ne].set(
        Wei.T.astype(jnp.float32))
    ea = jnp.zeros((1, ni_p), jnp.float32).at[:, :ni].set(
        jnp.exp(alpha).reshape(1, ni).astype(jnp.float32))
    g_row = jnp.zeros((1, ne_p), jnp.float32).at[:, :ne].set(
        g.reshape(1, ne).astype(jnp.float32))
    b_row = jnp.zeros((1, ne_p), jnp.float32).at[:, :ne].set(
        bias.reshape(1, ne).astype(jnp.float32))

    return dict(w_in=w_in, w_zi=w_zi, ea=ea, g_row=g_row, b_row=b_row,
                d=d, d_p=d_p, d_tile=d_tile, ne=ne, ni=ni, ne_p=ne_p, ni_p=ni_p,
                mm_dtype=mm_dtype, vmem_limit=vmem_limit)


def _choose_tb(B, max_tb=1024):
    """Pick a batch tile: prefer a divisor of B (no padding), >=2 grid steps
    when possible (v7x megacore); small batches get one minimally padded tile."""
    for cand in (1024, 512, 256, 128):
        if cand <= max_tb and B % cand == 0 and B // cand >= 2:
            return cand
    for cand in (1024, 512, 256, 128):
        if cand <= max_tb and B % cand == 0:
            return cand
    if B <= max_tb:
        return _round_up(B, 8)           # single slightly-padded tile
    return min(512, max_tb)              # large ragged batch


# ----------------------------------------------------------------------------
# Forward wrapper
# ----------------------------------------------------------------------------
def ei_dense_with_shunt_prepared(x, params, *, tb=None):
    """x: (B, n_input). Returns (h (B, ne), mu_z (B, 1), std_z (B, 1))."""
    B, d = x.shape
    assert d == params["d"]
    ne, ne_p, ni_p = params["ne"], params["ne_p"], params["ni_p"]
    d_p, td = params["d_p"], params["d_tile"]
    mm_dtype = params["mm_dtype"]
    vmem_limit = params["vmem_limit"]
    out_dtype = x.dtype

    if tb is None:
        tb = _choose_tb(B)

    def _vmem_estimate(tb_):
        nk_ = d_p // td
        w_in_b = (1 if nk_ == 1 else 2) * td * (ne_p + ni_p) * mm_dtype.itemsize
        x_b = 2 * tb_ * td * mm_dtype.itemsize
        h_b = 2 * tb_ * ne_p * jnp.dtype(out_dtype).itemsize
        acc_b = tb_ * (ne_p + ni_p) * 4
        w_zi_b = ni_p * ne_p * 4
        tmp_b = 5 * tb_ * ne_p * 4 + 3 * tb_ * ni_p * 4   # epilogue temporaries
        return w_in_b + w_zi_b + x_b + h_b + acc_b + tmp_b

    # Shrink the batch tile (to a 128-multiple) if the estimate overflows VMEM.
    while tb > 128 and _vmem_estimate(tb) > (4 * vmem_limit) // 5:
        tb = max(128, _round_up(tb // 2, 128))

    x_in = x.astype(mm_dtype)
    if d_p != d:
        x_in = jnp.pad(x_in, ((0, 0), (0, d_p - d)))
    B_pad = _round_up(B, tb)
    if B_pad != B:
        # Padded rows are benign: z_hat = 0, gamma = eps, z = b; sliced off below.
        x_in = jnp.pad(x_in, ((0, B_pad - B), (0, 0)))

    nb, nk = B_pad // tb, d_p // td
    resident = pl.Buffered(1)                    # constant-index blocks: 1 buffer
    w_in_mode = resident if nk == 1 else None    # streamed -> default double buffer

    kernel = functools.partial(ei_shunt_kernel, ne=ne)
    h, stats = pl.pallas_call(
        kernel,
        out_shape=(
            jax.ShapeDtypeStruct((B_pad, ne_p), out_dtype),   # h (neuron-padded)
            jax.ShapeDtypeStruct((2, B_pad), jnp.float32),    # [mu; std], lane-dense
        ),
        grid_spec=pltpu.PrefetchScalarGridSpec(
            num_scalar_prefetch=0,
            grid=(nb, nk),
            in_specs=[
                pl.BlockSpec((tb, td), lambda i, k: (i, k)),                  # x
                pl.BlockSpec((td, ne_p + ni_p), lambda i, k: (k, 0),
                             pipeline_mode=w_in_mode),                        # [WexT|WixT]
                pl.BlockSpec((ni_p, ne_p), lambda i, k: (0, 0),
                             pipeline_mode=resident),                         # WeiT (f32)
                pl.BlockSpec((1, ni_p), lambda i, k: (0, 0),
                             pipeline_mode=resident),                         # exp(alpha)
                pl.BlockSpec((1, ne_p), lambda i, k: (0, 0),
                             pipeline_mode=resident),                         # g
                pl.BlockSpec((1, ne_p), lambda i, k: (0, 0),
                             pipeline_mode=resident),                         # bias
            ],
            out_specs=[
                pl.BlockSpec((tb, ne_p), lambda i, k: (i, 0)),
                pl.BlockSpec((2, tb), lambda i, k: (0, i)),
            ],
            scratch_shapes=[pltpu.VMEM((tb, ne_p + ni_p), jnp.float32)],
        ),
        compiler_params=pltpu.CompilerParams(
            dimension_semantics=("parallel", "arbitrary"),
            vmem_limit_bytes=vmem_limit),
    )(x_in, params["w_in"], params["w_zi"], params["ea"],
      params["g_row"], params["b_row"])

    h = h[:B, :ne]
    mu = stats[0, :B].reshape(B, 1)
    std = stats[1, :B].reshape(B, 1)
    return h, mu, std


def ei_dense_with_shunt(x, Wex, Wix, Wei, alpha, g, bias, *,
                        tb=None, matmul_dtype=jnp.bfloat16):
    """Convenience wrapper (prepares params every call).  For repeated forwards
    with fixed weights, call prepare_params() once and reuse it with
    ei_dense_with_shunt_prepared()."""
    params = prepare_params(Wex, Wix, Wei, alpha, g, bias, matmul_dtype=matmul_dtype)
    return ei_dense_with_shunt_prepared(x, params, tb=tb)


# ----------------------------------------------------------------------------
# Reference init + forward (for the self-check)
# ----------------------------------------------------------------------------
def init_params(key, n_input, ne, ni, numerator=2, k=1):
    """Deterministic re-implementation of EiDenseLayer.init_weights (lognormal)
    plus the shunt parameters described in EiDenseWithShunt.init_weights."""
    target_std = np.sqrt(numerator * ne / (n_input * (ne - 1)))
    mean, var = target_std * k, target_std ** 2
    mu_ln = np.log(mean ** 2 / np.sqrt(mean ** 2 + var))
    sigma_ln = np.sqrt(np.log(1 + var / mean ** 2))

    k1, k2 = jax.random.split(key)
    Wex = jnp.exp(jax.random.normal(k1, (ne, n_input)) * sigma_ln + mu_ln)
    Wei = jnp.exp(jax.random.normal(k2, (ne, ni)) * sigma_ln + mu_ln)
    Wei = Wei / jnp.sum(Wei, axis=1, keepdims=True)
    Wix = jnp.ones((ni, 1)) * jnp.mean(Wex, axis=0, keepdims=True)

    bias = jnp.zeros((ne, 1), jnp.float32)
    g = jnp.ones((ne, 1), jnp.float32)

    # shunt init: exp(alpha) = (1 - c)/ne * E[Wex] * E[X], c = (sqrt(5)-1)/2
    c = (5 ** 0.5 - 1) / 2
    e_wex = target_std
    e_x = 1.0 / np.sqrt(2 * np.pi)
    alpha_val = np.log((1 - c) / ne * e_wex * e_x)
    alpha = jnp.full((1, ni), alpha_val, jnp.float32)

    return (Wex.astype(jnp.float32), Wix.astype(jnp.float32),
            Wei.astype(jnp.float32), alpha, g, bias)


def reference_forward(x, Wex, Wix, Wei, alpha, g, bias):
    """Plain-JAX transcription of the PyTorch forward (feature-major math)."""
    xT = x.T                                        # (d, B)
    ze = Wex @ xT                                   # (ne, B)
    zi = Wix @ xT                                   # (ni, B)
    z_hat = ze - Wei @ zi
    gamma = (jnp.exp(alpha) * Wei) @ zi + EPSILON
    z = g * (z_hat / gamma) + bias
    mu = jnp.mean(z_hat, axis=0, keepdims=True)     # (1, B)
    std = jnp.std(z_hat, axis=0, keepdims=True, ddof=1)
    return z.T, mu.T, std.T


if __name__ == "__main__":
    key = jax.random.PRNGKey(0)
    B, n_input, ne = 16, 32, 32
    ni = int(ne * 0.1)  # = 3

    kx, kp = jax.random.split(key)
    x = jax.random.normal(kx, (B, n_input), dtype=jnp.float32)
    Wex, Wix, Wei, alpha, g, bias = init_params(kp, n_input, ne, ni)

    h_ref, mu_ref, std_ref = reference_forward(x, Wex, Wix, Wei, alpha, g, bias)

    # f32 MXU path: checked tightly against the plain-JAX transcription.
    p_f32 = prepare_params(Wex, Wix, Wei, alpha, g, bias, matmul_dtype=jnp.float32)
    h, mu_z, std_z = ei_dense_with_shunt_prepared(x, p_f32)
    jax.block_until_ready((h, mu_z, std_z))

    assert h.shape == (B, ne) and mu_z.shape == (B, 1) and std_z.shape == (B, 1)
    assert jnp.allclose(h, h_ref, atol=1e-4, rtol=1e-4)
    assert jnp.allclose(mu_z, mu_ref, atol=1e-4, rtol=1e-4)
    assert jnp.allclose(std_z, std_ref, atol=1e-4, rtol=1e-4)

    # Default perf path: bf16 x / [WexT|WixT] on the MXU, Wei / shunt / stats f32.
    # (The shunt division amplifies bf16 rounding near gamma ~ 0, so only the
    #  division-free stats are value-checked, loosely.)
    h_bf, mu_bf, std_bf = ei_dense_with_shunt(x, Wex, Wix, Wei, alpha, g, bias)
    jax.block_until_ready((h_bf, mu_bf, std_bf))
    assert h_bf.shape == (B, ne)
    assert bool(jnp.isfinite(h_bf).all())
    assert jnp.allclose(mu_bf, mu_ref, atol=5e-2, rtol=5e-2)
    assert jnp.allclose(std_bf, std_ref, atol=5e-2, rtol=5e-2)

    print("KERNEL_OK")
</pallas_src>

<mosaic_0001>
module attributes {stable_mosaic.version = 11 : i64} {
  func.func @ei_shunt_kernel(%arg0: i32, %arg1: i32, %arg2: memref<16x32xf32, #tpu.memory_space<vmem>>, %arg3: memref<32x136xf32, #tpu.memory_space<vmem>>, %arg4: memref<8x128xf32, #tpu.memory_space<vmem>>, %arg5: memref<1x8xf32, #tpu.memory_space<vmem>>, %arg6: memref<1x128xf32, #tpu.memory_space<vmem>>, %arg7: memref<1x128xf32, #tpu.memory_space<vmem>>, %arg8: memref<16x128xf32, #tpu.memory_space<vmem>>, %arg9: memref<2x16xf32, #tpu.memory_space<vmem>>, %arg10: memref<16x136xf32, #tpu.memory_space<vmem>>) attributes {dimension_semantics = [#tpu.dimension_semantics<parallel>, #tpu.dimension_semantics<arbitrary>], iteration_bounds = array<i64: 1, 1>, scalar_prefetch = 0 : i64, scratch_operands = 1 : i64, tpu.core_type = #tpu.core_type<tc>, window_params = [{transform_indices = @transform_0, window_bounds = array<i64: 16, 32>}, {pipeline_mode = #tpu.pipeline_mode<synchronous>, transform_indices = @transform_1, window_bounds = array<i64: 32, 136>}, {pipeline_mode = #tpu.pipeline_mode<synchronous>, transform_indices = @transform_2, window_bounds = array<i64: 8, 128>}, {pipeline_mode = #tpu.pipeline_mode<synchronous>, transform_indices = @transform_3, window_bounds = array<i64: 1, 8>}, {pipeline_mode = #tpu.pipeline_mode<synchronous>, transform_indices = @transform_4, window_bounds = array<i64: 1, 128>}, {pipeline_mode = #tpu.pipeline_mode<synchronous>, transform_indices = @transform_5, window_bounds = array<i64: 1, 128>}, {transform_indices = @transform_6, window_bounds = array<i64: 16, 128>}, {transform_indices = @transform_7, window_bounds = array<i64: 2, 16>}]} {
    %c0_i32 = arith.constant 0 : i32
    %0 = arith.cmpi eq, %arg1, %c0_i32 : i32
    %1 = arith.extui %0 : i1 to i32
    %c0_i32_0 = arith.constant 0 : i32
    %2 = arith.cmpi ne, %1, %c0_i32_0 : i32
    scf.if %2 {
      %cst_10 = arith.constant 0.000000e+00 : f32
      %12 = vector.broadcast %cst_10 : f32 to vector<16x136xf32>
      %c0_11 = arith.constant 0 : index
      %c0_12 = arith.constant 0 : index
      %13 = vector.load %arg10[%c0_11, %c0_12] : memref<16x136xf32, #tpu.memory_space<vmem>>, vector<16x136xf32>
      tpu.vector_store %arg10[%c0_11, %c0_12], %12 {strides = array<i32>} : memref<16x136xf32, #tpu.memory_space<vmem>>, vector<16x136xf32>,
    } else {
    }
    %c0 = arith.constant 0 : index
    %c0_1 = arith.constant 0 : index
    %3 = vector.load %arg10[%c0, %c0_1] : memref<16x136xf32, #tpu.memory_space<vmem>>, vector<16x136xf32>
    %c0_2 = arith.constant 0 : index
    %c0_3 = arith.constant 0 : index
    %4 = vector.load %arg2[%c0_2, %c0_3] : memref<16x32xf32, #tpu.memory_space<vmem>>, vector<16x32xf32>
    %c0_4 = arith.constant 0 : index
    %c0_5 = arith.constant 0 : index
    %5 = vector.load %arg3[%c0_4, %c0_5] : memref<32x136xf32, #tpu.memory_space<vmem>>, vector<32x136xf32>
    %cst = arith.constant dense<0.000000e+00> : vector<16x136xf32>
    %6 = tpu.matmul %4, %5, %cst {dimension_numbers = #tpu.dot_dimension_numbers<[1], [0], [0], [1], [0, 0, 1, 1], [], []>} : vector<16x32xf32>, vector<32x136xf32>, vector<16x136xf32> -> vector<16x136xf32>
    %7 = arith.addf %3, %6 : vector<16x136xf32>
    %c0_6 = arith.constant 0 : index
    %c0_7 = arith.constant 0 : index
    %8 = vector.load %arg10[%c0_6, %c0_7] : memref<16x136xf32, #tpu.memory_space<vmem>>, vector<16x136xf32>
    tpu.vector_store %arg10[%c0_6, %c0_7], %7 {strides = array<i32>} : memref<16x136xf32, #tpu.memory_space<vmem>>, vector<16x136xf32>,
    %c0_i32_8 = arith.constant 0 : i32
    %9 = arith.cmpi eq, %arg1, %c0_i32_8 : i32
    %10 = arith.extui %9 : i1 to i32
    %c0_i32_9 = arith.constant 0 : i32
    %11 = arith.cmpi ne, %10, %c0_i32_9 : i32
    scf.if %11 {
      %c0_10 = arith.constant 0 : index
      %c0_11 = arith.constant 0 : index
      %12 = vector.load %arg10[%c0_10, %c0_11] : memref<16x136xf32, #tpu.memory_space<vmem>>, vector<16x136xf32>
      %13 = vector.extract_strided_slice %12 {offsets = [0, 0], sizes = [16, 128], strides = [1, 1]} : vector<16x136xf32> to vector<16x128xf32>
      %14 = vector.extract_strided_slice %12 {offsets = [0, 128], sizes = [16, 8], strides = [1, 1]} : vector<16x136xf32> to vector<16x8xf32>
      %c0_12 = arith.constant 0 : index
      %c0_13 = arith.constant 0 : index
      %15 = vector.load %arg5[%c0_12, %c0_13] : memref<1x8xf32, #tpu.memory_space<vmem>>, vector<1x8xf32>
      %16 = vector.broadcast %15 : vector<1x8xf32> to vector<16x8xf32>
      %17 = arith.mulf %14, %16 : vector<16x8xf32>
      %c0_14 = arith.constant 0 : index
      %c0_15 = arith.constant 0 : index
      %18 = vector.load %arg4[%c0_14, %c0_15] : memref<8x128xf32, #tpu.memory_space<vmem>>, vector<8x128xf32>
      %cst_16 = arith.constant dense<0.000000e+00> : vector<16x128xf32>
      %19 = tpu.matmul %14, %18, %cst_16 {dimension_numbers = #tpu.dot_dimension_numbers<[1], [0], [0], [1], [0, 0, 1, 1], [], []>} : vector<16x8xf32>, vector<8x128xf32>, vector<16x128xf32> -> vector<16x128xf32>
      %cst_17 = arith.constant dense<0.000000e+00> : vector<16x128xf32>
      %20 = tpu.matmul %17, %18, %cst_17 {dimension_numbers = #tpu.dot_dimension_numbers<[1], [0], [0], [1], [0, 0, 1, 1], [], []>} : vector<16x8xf32>, vector<8x128xf32>, vector<16x128xf32> -> vector<16x128xf32>
      %cst_18 = arith.constant 9.99999993E-9 : f32
      %21 = vector.broadcast %cst_18 : f32 to vector<16x128xf32>
      %22 = arith.addf %20, %21 : vector<16x128xf32>
      %23 = arith.subf %13, %19 : vector<16x128xf32>
      %c0_19 = arith.constant 0 : index
      %c0_20 = arith.constant 0 : index
      %24 = vector.load %arg6[%c0_19, %c0_20] : memref<1x128xf32, #tpu.memory_space<vmem>>, vector<1x128xf32>
      %25 = arith.divf %23, %22 : vector<16x128xf32>
      %26 = vector.broadcast %24 : vector<1x128xf32> to vector<16x128xf32>
      %27 = arith.mulf %26, %25 : vector<16x128xf32>
      %c0_21 = arith.constant 0 : index
      %c0_22 = arith.constant 0 : index
      %28 = vector.load %arg7[%c0_21, %c0_22] : memref<1x128xf32, #tpu.memory_space<vmem>>, vector<1x128xf32>
      %29 = vector.broadcast %28 : vector<1x128xf32> to vector<16x128xf32>
      %30 = arith.addf %27, %29 : vector<16x128xf32>
      %c0_23 = arith.constant 0 : index
      %c0_24 = arith.constant 0 : index
      %31 = vector.load %arg8[%c0_23, %c0_24] : memref<16x128xf32, #tpu.memory_space<vmem>>, vector<16x128xf32>
      tpu.vector_store %arg8[%c0_23, %c0_24], %30 {strides = array<i32>} : memref<16x128xf32, #tpu.memory_space<vmem>>, vector<16x128xf32>,
      %32 = tpu.iota {dimensions = array<i32: 1>} : vector<16x128xi32>
      %c32_i32 = arith.constant 32 : i32
      %33 = vector.broadcast %c32_i32 : i32 to vector<16x128xi32>
      %34 = arith.cmpi slt, %32, %33 : vector<16x128xi32>
      %cst_25 = arith.constant 0.000000e+00 : f32
      %35 = vector.broadcast %cst_25 : f32 to vector<16x128xf32>
      %36 = arith.select %34, %23, %35 : vector<16x128xi1>, vector<16x128xf32>
      %cst_26 = arith.constant dense<0.000000e+00> : vector<16xf32>
      %37 = vector.multi_reduction <add>, %36, %cst_26 [1] : vector<16x128xf32> to vector<16xf32>
      %38 = vector.shape_cast %37 : vector<16xf32> to vector<16x1xf32>
      %cst_27 = arith.constant 3.125000e-02 : f32
      %39 = vector.broadcast %cst_27 : f32 to vector<16x1xf32>
      %40 = arith.mulf %38, %39 : vector<16x1xf32>
      %41 = vector.broadcast %40 : vector<16x1xf32> to vector<16x128xf32>
      %42 = arith.subf %23, %41 : vector<16x128xf32>
      %cst_28 = arith.constant 0.000000e+00 : f32
      %43 = vector.broadcast %cst_28 : f32 to vector<16x128xf32>
      %44 = arith.select %34, %42, %43 : vector<16x128xi1>, vector<16x128xf32>
      %45 = arith.mulf %44, %44 : vector<16x128xf32>
      %cst_29 = arith.constant dense<0.000000e+00> : vector<16xf32>
      %46 = vector.multi_reduction <add>, %45, %cst_29 [1] : vector<16x128xf32> to vector<16xf32>
      %47 = vector.shape_cast %46 : vector<16xf32> to vector<16x1xf32>
      %cst_30 = arith.constant 0.0322580636 : f32
      %48 = vector.broadcast %cst_30 : f32 to vector<16x1xf32>
      %49 = arith.mulf %47, %48 : vector<16x1xf32>
      %50 = math.sqrt %49 : vector<16x1xf32>
      %51 = tpu.iota {dimensions = array<i32: 1>} : vector<16x128xi32>
      %c0_i32_31 = arith.constant 0 : i32
      %52 = vector.broadcast %c0_i32_31 : i32 to vector<16x128xi32>
      %53 = arith.cmpi eq, %51, %52 : vector<16x128xi32>
      %c1_i32 = arith.constant 1 : i32
      %54 = vector.broadcast %c1_i32 : i32 to vector<16x128xi32>
      %55 = arith.cmpi eq, %51, %54 : vector<16x128xi32>
      %cst_32 = arith.constant 0.000000e+00 : f32
      %56 = vector.shape_cast %50 : vector<16x1xf32> to vector<16x1xf32>
      %57 = vector.broadcast %56 : vector<16x1xf32> to vector<16x128xf32>
      %58 = vector.broadcast %cst_32 : f32 to vector<16x128xf32>
      %59 = arith.select %55, %57, %58 : vector<16x128xi1>, vector<16x128xf32>
      %60 = vector.shape_cast %40 : vector<16x1xf32> to vector<16x1xf32>
      %61 = vector.broadcast %60 : vector<16x1xf32> to vector<16x128xf32>
      %62 = arith.select %53, %61, %59 : vector<16x128xi1>, vector<16x128xf32>
      %63 = tpu.transpose %62, [1, 0] : vector<16x128xf32> -> vector<128x16xf32>
      %64 = vector.extract_strided_slice %63 {offsets = [0, 0], sizes = [2, 16], strides = [1, 1]} : vector<128x16xf32> to vector<2x16xf32>
      %c0_33 = arith.constant 0 : index
      %c0_34 = arith.constant 0 : index
      %65 = vector.load %arg9[%c0_33, %c0_34] : memref<2x16xf32, #tpu.memory_space<vmem>>, vector<2x16xf32>
      tpu.vector_store %arg9[%c0_33, %c0_34], %64 {strides = array<i32>} : memref<2x16xf32, #tpu.memory_space<vmem>>, vector<2x16xf32>,
    } else {
    }
    return
  }
  func.func @transform_0(%arg0: i32, %arg1: i32) -> (i32, i32) {
    %c0_i32 = arith.constant 0 : i32
    return %arg0, %arg1 : i32, i32
  }
  func.func @transform_1(%arg0: i32, %arg1: i32) -> (i32, i32) {
    %c0_i32 = arith.constant 0 : i32
    %c0_i32_0 = arith.constant 0 : i32
    return %arg1, %c0_i32 : i32, i32
  }
  func.func @transform_2(%arg0: i32, %arg1: i32) -> (i32, i32) {
    %c0_i32 = arith.constant 0 : i32
    %c0_i32_0 = arith.constant 0 : i32
    %c0_i32_1 = arith.constant 0 : i32
    return %c0_i32, %c0_i32_0 : i32, i32
  }
  func.func @transform_3(%arg0: i32, %arg1: i32) -> (i32, i32) {
    %c0_i32 = arith.constant 0 : i32
    %c0_i32_0 = arith.constant 0 : i32
    %c0_i32_1 = arith.constant 0 : i32
    return %c0_i32, %c0_i32_0 : i32, i32
  }
  func.func @transform_4(%arg0: i32, %arg1: i32) -> (i32, i32) {
    %c0_i32 = arith.constant 0 : i32
    %c0_i32_0 = arith.constant 0 : i32
    %c0_i32_1 = arith.constant 0 : i32
    return %c0_i32, %c0_i32_0 : i32, i32
  }
  func.func @transform_5(%arg0: i32, %arg1: i32) -> (i32, i32) {
    %c0_i32 = arith.constant 0 : i32
    %c0_i32_0 = arith.constant 0 : i32
    %c0_i32_1 = arith.constant 0 : i32
    return %c0_i32, %c0_i32_0 : i32, i32
  }
  func.func @transform_6(%arg0: i32, %arg1: i32) -> (i32, i32) {
    %c0_i32 = arith.constant 0 : i32
    %c0_i32_0 = arith.constant 0 : i32
    return %arg0, %c0_i32 : i32, i32
  }
  func.func @transform_7(%arg0: i32, %arg1: i32) -> (i32, i32) {
    %c0_i32 = arith.constant 0 : i32
    %c0_i32_0 = arith.constant 0 : i32
    return %c0_i32, %arg0 : i32, i32
  }
}

</mosaic_0001>

<bundles_post_ra>
// kernel: tpu_custom_call.1
= control target key start
LH: loop header
LB: loop body
LE: loop exit
PB: predicated region body
PF: predicated region fallthrough
CT: control target
= control target key end

     0   :  { %13 = vsyncpa [#allocation4], 0  ;;  %s756_s0 = inlined_call_operand.hbm [shape: f32[16,32], index: 0, kind: input, shape index: {}]   ;;  %s757_s1 = inlined_call_operand.hbm [shape: f32[32,136], index: 1, kind: input, shape index: {}]   ;;  %s758_s2 = inlined_call_operand.hbm [shape: f32[8,128], index: 2, kind: input, shape index: {}]   ;;  %s759_s3 = inlined_call_operand.vmem [shape: f32[1,8], index: 3, kind: input, shape index: {}]   ;;  %s760_s4 = inlined_call_operand.vmem [shape: f32[1,128], index: 4, kind: input, shape index: {}]   ;;  %s761_s5 = inlined_call_operand.vmem [shape: f32[1,128], index: 5, kind: input, shape index: {}]   ;;  %s762_s6 = inlined_call_operand.hbm [shape: f32[16,128], index: 6, kind: output, shape index: {0}]   ;;  %s763_s7 = inlined_call_operand.hbm [shape: f32[2,16], index: 7, kind: output, shape index: {1}]  }
   0x1   :  { %14 = vsyncpa [#allocation7], 0 }
   0x2   :  { %15 = vsyncpa [#allocation5], 0 }
   0x3   :  { %16 = vsyncpa [#allocation11], 0  ;;  %s647_s24 = smov [#allocation6]  }
   0x4   :  { %s34_s25 = sshll.u32 %s647_s24, 4  ;;  %s35_s25 = int_to_ptr.vmem [resolvable:$true] %s34_s25 }
   0x5   :  { %s547_s26 = scalar_lea.vmem %s35_s25, 1024  ;;  %p552_p1 = scmp.lt.s32.totalorder %s35_s25, %s35_s25 }
   0x6   :  { %p548_p0 = scmp.ne.s32.totalorder %s35_s25, %s547_s26  ;;  %p553_p2 = scmp.lt.s32.totalorder %s547_s26, %s547_s26 }
   0x8   :  { %p554_p3 = por %p553_p2, %p552_p1 }
   0xa   :  { %p555_p4 = pnand %p554_p3, %p548_p0 }
   0xc   :  { %558 = shalt.err (!%p555_p4)
}
   0xd   :  { %s648_s27 = smov 256   ;;  %s649_s28 = smov 16  }
   0xe   :  { %40 = dma.hbm_to_vmem [thread:$0]  %s757_s1, 1024, %s35_s25, [#allocation7], %s648_s27, %s648_s27, %s649_s28  }
   0xf   :  { %s650_s8 = smov [#allocation3]  }
  0x10   :  { %s22_s9 = sshll.u32 %s650_s8, 4  ;;  %s23_s9 = int_to_ptr.vmem [resolvable:$true] %s22_s9 }
  0x11   :  { %s567_s10 = scalar_lea.vmem %s23_s9, 256  ;;  %p572_p6 = scmp.lt.s32.totalorder %s23_s9, %s23_s9 }
  0x12   :  { %p568_p5 = scmp.ne.s32.totalorder %s23_s9, %s567_s10  ;;  %p573_p7 = scmp.lt.s32.totalorder %s567_s10, %s567_s10 }
  0x14   :  { %p574_p8 = por %p573_p7, %p572_p6 }
  0x16   :  { %p575_p9 = pnand %p574_p8, %p568_p5 }
  0x18   :  { %578 = shalt.err (!%p575_p9)
}
  0x19   :  { %s651_s11 = smov 128   ;;  %s652_s12 = smov 8  }
  0x1a   :  { %28 = dma.hbm_to_vmem [thread:$0]  %s756_s0, 256, %s23_s9, [#allocation4], %s651_s11, %s651_s11, %s652_s12  }
  0x1b   :  { %s653_s1 = smov [#allocation8]  }
  0x1c   :  { %s47_s15 = sshll.u32 %s653_s1, 4  ;;  %s48_s15 = int_to_ptr.vmem [resolvable:$true] %s47_s15 }
  0x1d   :  { %s587_s16 = scalar_lea.vmem %s48_s15, 128  ;;  %p592_p11 = scmp.lt.s32.totalorder %s48_s15, %s48_s15 }
  0x1e   :  { %p588_p10 = scmp.ne.s32.totalorder %s48_s15, %s587_s16  ;;  %p593_p12 = scmp.lt.s32.totalorder %s587_s16, %s587_s16 }
  0x20   :  { %p594_p13 = por %p593_p12, %p592_p11 }
  0x22   :  { %p595_p0 = pnand %p594_p13, %p588_p10 }
  0x24   :  { %598 = shalt.err (!%p595_p0)
}
  0x25   :  { %50 = dma.hbm_to_vmem [thread:$0]  %s758_s2, 128, %s48_s15, [#allocation7]  }
  0x26   :  { %639 = dma.done.wait [#allocation4], 256  }
  0x27   :  { %640 = vsyncadd [#allocation4], 4294967040 }
  0x28   :  { %641 = dma.done.wait [#allocation7], 1152  }
  0x29   :  { %642 = vsyncadd [#allocation7], 4294966144  ;;  %v654_v0 = vmov 0.0   ;;  %v88_v1 = vld [vmem:[#allocation6 + $0x38] sm:$0xff]  ;;  %v87_v2 = vld [vmem:[#allocation6 + $0x30] sm:$0xff]  ;;  %vm89_vm0 = vcmask 261120   ;;  %v387_v25 = vlaneseq }
  0x2a   :  { %160 = vmatprep.mubr.f32.mxu0 %v654_v0  ;;  %v86_v3 = vld [vmem:[#allocation6 + $0x28] sm:$0xff]  ;;  %120 = vmatprep.subr.mxu0 %v88_v1  ;;  %v85_v4 = vld [vmem:[#allocation6 + $0x20] sm:$0xff]  ;;  %v84_v5 = vld [vmem:[#allocation6 + $0x18] sm:$0xff]  ;;  %vm71_vm1 = vcmask 64512  }
  0x2b   :  { %121 = vmatpush1.msra.mxu0 %v87_v2  ;;  %v83_v6 = vld [vmem:[#allocation6 + $0x10] sm:$0xff]  ;;  %v82_v7 = vld [vmem:[#allocation6 + $0x8] sm:$0xff]  ;;  %v81_v8 = vld [vmem:[#allocation6] sm:$0xff]  ;;  %72 = vst.msk [vmem:[#allocation2 + $0x8] sm:$0xff] %vm71_vm1, %v654_v0  ;;  %v720_v27 = vand.u32 127, %v387_v25 }
  0x2c   :  { %122 = vmatprep.subr.mxu0 %v86_v3  ;;  %v79_v9 = vld [vmem:[#allocation3] sm:$0xff]  ;;  %v80_v10 = vld [vmem:[#allocation3 + $0x8] sm:$0xff]  ;;  %74 = vst.msk [vmem:[#allocation2 + $0x18] sm:$0xff] %vm71_vm1, %v654_v0  ;;  %v198_v11 = vld [vmem:[#allocation8] sm:$0xff] }
  0x2d   :  { %123 = vmatpush1.msra.mxu0 %v85_v4  ;;  %511 = vmatprep.subr.mxu1 %v198_v11  ;;  %v498_v21 = vld [vmem:[%s759_s3] ss:$0 sm:$0xff]  ;;  %vm389_vm2 = vcmp.lt.s32.totalorder %v720_v27, 32  ;;  %vm425_vm4 = vcmp.eq.s32.totalorder %v720_v27, 1  ;;  %vm424_vm6 = vcmp.eq.s32.totalorder %v720_v27, 0 }
  0x2e   :  { %124 = vmatprep.subr.mxu0 %v84_v5  ;;  %512 = vmatpush3.msra.mxu1 %v198_v11  ;;  %v503_v38 = vld [vmem:[%s760_s4] ss:$0 sm:$0xff]  ;;  %s655_s4 = smov [#allocation9]  }
  0x2f   :  { %125 = vmatpush1.msra.mxu0 %v83_v6  ;;  %516 = vmatprep.subr.mxu1 %v198_v11  ;;  %v504_v41 = vld [vmem:[%s761_s5] ss:$0 sm:$0xff]  ;;  %s469_s5 = sshll.u32 %s655_s4, 4  ;;  %s470_s5 = int_to_ptr.vmem [resolvable:$true] %s469_s5 }
  0x30   :  { %126 = vmatprep.subr.mxu0 %v82_v7  ;;  %s599_s22 = scalar_lea.vmem %s470_s5, 256  ;;  %p604_p2 = scmp.lt.s32.totalorder %s470_s5, %s470_s5 }
  0x31   :  { %127 = vmatpush1.msra.mxu0 %v81_v8  ;;  %p600_p1 = scmp.ne.s32.totalorder %s470_s5, %s599_s22  ;;  %p605_p3 = scmp.lt.s32.totalorder %s599_s22, %s599_s22 }
  0x32   :  { %496 = vmatmul.mubr.msk.f32.vlgmr.msra.gmra.mxu0 %vm89_vm0, %v79_v9  ;;  %v76_v13 = vld [vmem:[#allocation2 + $0x8] sm:$0xff] }
  0x33   :  { %166 = vmatprep.mubr.f32.mxu0 %v654_v0  ;;  %v78_v17 = vld [vmem:[#allocation2 + $0x18] sm:$0xff]  ;;  %p606_p4 = por %p605_p3, %p604_p2 }
  0x35   :  { %p607_p5 = pnand %p606_p4, %p600_p1 }
  0x36   :  { %497 = vmatmul.mubr.msk.f32.gmra.mxu0 %vm89_vm0, %v80_v10 }
  0xf2   :  { %v162_v12 = vpop.f32.mrf.mxu0 }
  0xf4   :  { %v164_v14 = vpop.f32.mrf.mxu0 }
  0xf5   :  { %v174_v15 = vadd.f32 %v164_v14, %v76_v13 }
  0xf6   :  { %v168_v16 = vpop.f32.mrf.mxu0 }
  0xf7   :  { %179 = vst.msk [vmem:[#allocation2 + $0x8] sm:$0xff] %vm71_vm1, %v174_v15 }
  0xf8   :  { %v170_v18 = vpop.f32.mrf.mxu0 }
  0xf9   :  { %v176_v19 = vadd.f32 %v170_v18, %v78_v17 }
  0xfb   :  { %181 = vst.msk [vmem:[#allocation2 + $0x18] sm:$0xff] %vm71_vm1, %v176_v19 }
  0xfe   :  { %v186_v20 = vld [vmem:[#allocation2 + $0x8] sm:$0xff] }
  0xff   :  { %513 = vmatprep.mubr.msk.f32.mxu1 %vm71_vm1, %v186_v20  ;;  %v196_v23 = vmul.f32 %v498_v21, %v186_v20 }
 0x102   :  { %v188_v22 = vld [vmem:[#allocation2 + $0x18] sm:$0xff] }
 0x103   :  { %514 = vmatmul.mubr.msk.f32.vlgmr.msra.gmra.mxu1 %vm71_vm1, %v188_v22  ;;  %v197_v24 = vmul.f32 %v498_v21, %v188_v22 }
 0x104   :  { %518 = vmatprep.mubr.msk.f32.mxu1 %vm71_vm1, %v196_v23  ;;  %517 = vmatpush3.msra.mxu1 %v198_v11 }
 0x107   :  { %519 = vmatmul.mubr.msk.f32.vlgmr.msra.gmra.mxu1 %vm71_vm1, %v197_v24 }
 0x1c3   :  { %v515_v26 = vpop.f32.mrf.mxu1 }
 0x1c4   :  { %v362_v31 = vsub.f32 %v168_v16, %v515_v26 }
 0x1c5   :  { %v271_v28 = vpop.f32.mrf.mxu1 }
 0x1c6   :  { %v361_v29 = vsub.f32 %v162_v12, %v271_v28  ;;  %v391_v36 = vsel %vm389_vm2, %v362_v31, 0.0 }
 0x1c7   :  { %v520_v30 = vpop.f32.mrf.mxu1 }
 0x1c8   :  { %v358_v32 = vadd.f32 1e-08, %v520_v30  ;;  %v390_v33 = vsel %vm389_vm2, %v361_v29, 0.0 }
 0x1c9   :  { %v352_v34 = vpop.f32.mrf.mxu1  ;;  %392 = vadd.xlane.f32.xlu0 %v390_v33 }
 0x1ca   :  { %531 = vrcp.f32 %v358_v32  ;;  %v353_v35 = vadd.f32 1e-08, %v352_v34 }
 0x1cc   :  { %533 = vrcp.f32 %v353_v35 }
 0x1cd   :  { %394 = vadd.xlane.f32.xlu0 %v391_v36 }
 0x1d7   :  { %v532_v37 = vpop.eup %531 }
 0x1d8   :  { %v367_v39 = vmul.f32 %v532_v37, %v362_v31 }
 0x1d9   :  { %v534_v40 = vpop.eup %533 }
 0x1da   :  { %v365_v42 = vmul.f32 %v534_v40, %v361_v29  ;;  %v375_v43 = vmul.f32 %v503_v38, %v367_v39 }
 0x1dc   :  { %v374_v44 = vmul.f32 %v503_v38, %v365_v42  ;;  %v384_v45 = vadd.f32 %v504_v41, %v375_v43 }
 0x1de   :  { %v383_v46 = vadd.f32 %v504_v41, %v374_v44  ;;  %386 = vst [vmem:[#allocation9 + $0x8] sm:$0xff] %v384_v45 }
 0x1e0   :  { %385 = vst [vmem:[#allocation9] sm:$0xff] %v383_v46 }
 0x252   :  { %v393_v47 = vpop.xlane.xlu0 %392 }
 0x253   :  { %v396_v48 = vmul.f32 0.03125, %v393_v47 }
 0x255   :  { %v398_v49 = vsub.f32 %v361_v29, %v396_v48 }
 0x256   :  { %v395_v50 = vpop.xlane.xlu0 %394 }
 0x257   :  { %v397_v51 = vmul.f32 0.03125, %v395_v50  ;;  %v400_v52 = vsel %vm389_vm2, %v398_v49, 0.0 }
 0x258   :  { %v402_v53 = vmul.f32 %v400_v52, %v400_v52 }
 0x259   :  { %v399_v54 = vsub.f32 %v362_v31, %v397_v51 }
 0x25a   :  { %404 = vadd.xlane.f32.xlu1 %v402_v53 }
 0x25b   :  { %v401_v55 = vsel %vm389_vm2, %v399_v54, 0.0 }
 0x25c   :  { %v403_v56 = vmul.f32 %v401_v55, %v401_v55 }
 0x25e   :  { %406 = vadd.xlane.f32.xlu1 %v403_v56 }
 0x2e3   :  { %v405_v57 = vpop.xlane.xlu1 %404 }
 0x2e4   :  { %v408_v58 = vmul.f32 0.032258064, %v405_v57 }
 0x2e6   :  { %535 = vrsqrt.f32 %v408_v58  ;;  %vm412_vm3 = vcmp.eq.f32.partialorder %v408_v58, inf  ;;  %v415_v63 = vand.u32 2147483648, %v408_v58  ;;  %vm414_vm5 = vcmp.eq.f32.partialorder %v408_v58, 0.0 }
 0x2e7   :  { %v407_v59 = vpop.xlane.xlu1 %406 }
 0x2e8   :  { %v409_v60 = vmul.f32 0.032258064, %v407_v59 }
 0x2ea   :  { %537 = vrsqrt.f32 %v409_v60 }
 0x2f3   :  { %v536_v61 = vpop.eup %535 }
 0x2f4   :  { %v411_v62 = vmul.f32 %v536_v61, %v408_v58 }
 0x2f6   :  { %v413_v0 = vsel %vm412_vm3, %v408_v58, %v411_v62 }
 0x2f7   :  { %v538_v1 = vpop.eup %537  ;;  %v416_v2 = vsel %vm414_vm5, %v415_v63, %v413_v0 }
 0x2f8   :  { %v426_v3 = vsel %vm425_vm4, %v416_v2, 0.0  ;;  %v418_v4 = vmul.f32 %v538_v1, %v409_v60 }
 0x2f9   :  { %610 = shalt.err (!%p607_p5)
}
 0x2fa   :  { %475 = dma.vmem_to_hbm [thread:$0]  %s470_s5, 256, %s762_s6, [#allocation5], %s651_s11, %s651_s11, %s652_s12   ;;  %v428_v5 = vsel %vm424_vm6, %v396_v48, %v426_v3  ;;  %vm419_vm7 = vcmp.eq.f32.partialorder %v409_v60, inf  ;;  %v422_v6 = vand.u32 2147483648, %v409_v60  ;;  %vm421_vm8 = vcmp.eq.f32.partialorder %v409_v60, 0.0 }
 0x2fb   :  { %430 = vxpose.xlu0.b32.start [1/2] (short) (narrow) %v428_v5, 8  ;;  %v420_v7 = vsel %vm419_vm7, %v409_v60, %v418_v4  ;;  %s656_s25 = smov [#allocation10]   ;;  %vm462_vm9 = vcmask 123904  }
 0x2fc   :  { %v423_v8 = vsel %vm421_vm8, %v422_v6, %v420_v7  ;;  %s482_s26 = sshll.u32 %s656_s25, 4  ;;  %s483_s26 = int_to_ptr.vmem [resolvable:$true] %s482_s26 }
 0x2fd   :  { %v427_v9 = vsel %vm425_vm4, %v423_v8, 0.0  ;;  %s619_s6 = scalar_lea.vmem %s483_s26, 32  ;;  %p624_p7 = scmp.lt.s32.totalorder %s483_s26, %s483_s26 }
 0x2fe   :  { %v429_v10 = vsel %vm424_vm6, %v397_v51, %v427_v9  ;;  %p620_p6 = scmp.ne.s32.totalorder %s483_s26, %s619_s6  ;;  %p625_p8 = scmp.lt.s32.totalorder %s619_s6, %s619_s6 }
 0x2ff   :  { %431 = vxpose.xlu0.b32.end [2/2] (short) (narrow) %v429_v10, 8 }
 0x300   :  { %p626_p9 = por %p625_p8, %p624_p7 }
 0x302   :  { %p627_p10 = pnand %p626_p9, %p620_p6 }
 0x377   :  { %v446_v11 = vpop.trf.xlu0 }
 0x378   :  { %463 = vst.msk [vmem:[#allocation10] sm:$0x3] %vm462_vm9, %v446_v11 }
 0x379   :  { %630 = shalt.err (!%p627_p10)
}
 0x37a   :  { %485 = dma.vmem_to_hbm [thread:$0]  %s483_s26, 32, %s763_s7, [#allocation11]  }
 0x37b   :  { %643 = dma.done.wait [#allocation5], 256  }
 0x37c   :  { %644 = vsyncadd [#allocation5], 4294967040 }
 0x37d   :  { %645 = dma.done.wait [#allocation11], 32  }
 0x37e   :  { %646 = vsyncadd [#allocation11], 4294967264 }
 0x37f   :  { %492 = vsyncpa [#allocation4], 1 }
 0x380   :  { %493 = vsyncpa [#allocation7], 1 }
 0x381   :  { %494 = vsyncpa [#allocation5], 1 }
 0x382   :  { %495 = vsyncpa [#allocation11], 1 }

</bundles_post_ra>
